<compile_context>
chip_gen: v5e
topology: v5e:2x2
jax: 0.10.0
libtpu: 0.0.40
codegen_flags: <defaults>
</compile_context>

<pallas_src>
import jax
import jax.numpy as jnp
from jax.experimental import pallas as pl
from jax.experimental.pallas import tpu as pltpu

LAYER_DIMS = [4, 32, 32, 32, 8]
SKIP_CONNECTION = (2,)


def _num_tensorcores():
    """Best-effort TensorCore-per-chip count (v7x megacore = 2)."""
    try:
        info = pltpu.get_tpu_info()
        for attr in ("num_cores", "tensorcore_count", "core_count",
                     "num_tensorcores"):
            v = getattr(info, attr, None)
            if isinstance(v, int) and v > 0:
                return v
    except Exception:
        pass
    try:
        kind = jax.devices()[0].device_kind.lower()
        if "v7" in kind:
            return 2
    except Exception:
        pass
    return 1


def _make_mlp_kernel(layer_dims, skip_connection):
    """Build the kernel body for a fixed layer structure.

    Kernel refs: (x_ref, W0_stack, b0, <W, b per layer 1..n-1>, out_ref).
    Feature-major: x_ref [d_in, tn], out_ref [d_out, tn], weights [k_out, k_in]
    (bf16), biases [k_out, 1] (f32, broadcast along lanes).
    W0_stack = [W0; W_skip(l) for l in skip_connection]  -> one fused dot.
    """
    n_layers = len(layer_dims) - 1
    d0_out = layer_dims[1]
    # Row offsets of each skip layer's precomputed (W_skip @ x) slab inside y0.
    skip_rows = {}
    off = d0_out
    for li in sorted(skip_connection):
        k_out = layer_dims[li + 1]
        skip_rows[li] = (off, k_out)
        off += k_out

    def kernel(x_ref, *refs):
        out_ref = refs[-1]
        prm = refs[:-1]
        x_bf = x_ref[...].astype(jnp.bfloat16)                  # [d_in, tn]

        # Layer 0 + all skip terms in a single bf16 MXU dot (f32 accumulate).
        w0 = prm[0][...]                                        # bf16 [d0+S, d_in]
        b0 = prm[1][...]                                        # f32  [d0, 1]
        y0 = jnp.dot(w0, x_bf, preferred_element_type=jnp.float32)
        feat = y0[:d0_out] + b0
        if n_layers > 1:
            feat = jnp.maximum(feat, 0.0)                       # relu_

        idx = 2
        for li in range(1, n_layers):
            w = prm[idx][...]                                   # bf16 [k_out, k_in]
            b = prm[idx + 1][...]                               # f32  [k_out, 1]
            idx += 2
            y = jnp.dot(w, feat.astype(jnp.bfloat16),
                        preferred_element_type=jnp.float32) + b
            if li in skip_rows:
                ro, k = skip_rows[li]
                y = y + y0[ro:ro + k]                           # reuse fused skip dot
            feat = jnp.maximum(y, 0.0) if li != n_layers - 1 else y

        out_ref[...] = feat.astype(out_ref.dtype)               # lane-dense store
    return kernel


def mlp_with_skip_pallas(x2d, weights, biases, *,
                         skip_connection=SKIP_CONNECTION, tn=8192):
    """Run the MLP on flattened points.

    x2d:     [N, d_in] float32 (any N; padded internally along the lane axis).
    weights: torch nn.Linear layout, weights[i] is [k_out, k_in(+d_in if skip)].
    biases:  biases[i] is [k_out].
    tn:      lane tile (multiple of 128); clamped to the problem size.
    """
    N, d_in = x2d.shape
    n_layers = len(weights)
    layer_dims = [d_in] + [w.shape[0] for w in weights]
    d_out = layer_dims[-1]
    skip = tuple(sorted(skip_connection))
    assert 0 not in skip, "fused W0/W_skip stacking assumes layer 0 is not skip"

    # ---- lane-tile sizing (core-count aware) ----
    n_rounded = pl.cdiv(N, 128) * 128
    tn = max(128, min((tn // 128) * 128, n_rounded))
    cores = _num_tensorcores()
    if cores >= 2 and n_rounded >= cores * 128:
        # Keep >= num_cores grid steps so both v7x TensorCores get work;
        # never shrink tn on single-core chips (v5e / v6e).
        tn = min(tn, max(128, ((n_rounded // cores) // 128) * 128))
    n_pad = pl.cdiv(N, tn) * tn

    # Feature-major, lane-dense input: pad along lanes only (single XLA pad).
    x_t = jnp.pad(x2d.T.astype(jnp.float32), ((0, 0), (0, n_pad - N)))

    # ---- parameter prep: bf16 weights, f32 column biases, fused W0 stack ----
    w_bf = [w.astype(jnp.bfloat16) for w in weights]
    b_cols = [b.astype(jnp.float32).reshape(-1, 1) for b in biases]

    # torch.cat([feat, input], -1): columns [0:k_feat] multiply feat,
    # columns [k_feat:] multiply the original input.
    w0_parts = [w_bf[0]]
    for li in skip:
        w = w_bf[li]
        w0_parts.append(w[:, w.shape[1] - d_in:])               # W_skip slice
    w0_stack = jnp.concatenate(w0_parts, axis=0)                 # [d0+S, d_in]

    operands = [x_t, w0_stack, b_cols[0]]
    in_specs = [
        pl.BlockSpec((d_in, tn), lambda i: (0, i)),
        pl.BlockSpec(w0_stack.shape, lambda i: (0, 0)),
        pl.BlockSpec(b_cols[0].shape, lambda i: (0, 0)),
    ]
    for li in range(1, n_layers):
        w = w_bf[li]
        if li in skip:
            w = w[:, : w.shape[1] - d_in]                        # W_feat only
        operands += [w, b_cols[li]]
        in_specs += [pl.BlockSpec(w.shape, lambda i: (0, 0)),
                     pl.BlockSpec(b_cols[li].shape, lambda i: (0, 0))]

    out_spec = pl.BlockSpec((d_out, tn), lambda i: (0, i))

    out_t = pl.pallas_call(
        _make_mlp_kernel(layer_dims, skip),
        out_shape=jax.ShapeDtypeStruct((d_out, n_pad), jnp.float32),
        grid_spec=pltpu.PrefetchScalarGridSpec(
            num_scalar_prefetch=0,
            grid=(n_pad // tn,),
            in_specs=in_specs,
            out_specs=out_spec,
        ),
        compiler_params=pltpu.CompilerParams(
            dimension_semantics=("parallel",),
            vmem_limit_bytes=32 * 1024 * 1024,   # headroom for tn up to ~16384
        ),
    )(*operands)

    return out_t[:, :N].T                                        # back to [N, d_out]


def init_params(key, layer_dims, skip_connection):
    """Deterministic init mirroring torch.nn.Linear defaults (uniform
    +-1/sqrt(fan_in)), last-layer bias zeroed as in the module __init__.
    Weights kept in torch layout [k_out, k_in]."""
    pairs = list(zip(layer_dims[:-1], layer_dims[1:]))
    weights, biases = [], []
    for li, (k_in, k_out) in enumerate(pairs):
        if li in skip_connection:
            k_in += layer_dims[0]
        key, kw, kb = jax.random.split(key, 3)
        bound = 1.0 / (k_in ** 0.5)
        w = jax.random.uniform(kw, (k_out, k_in), jnp.float32, -bound, bound)
        if li == len(pairs) - 1:
            b = jnp.zeros((k_out,), jnp.float32)
        else:
            b = jax.random.uniform(kb, (k_out,), jnp.float32, -bound, bound)
        weights.append(w)
        biases.append(b)
    return weights, biases


def reference_mlp(x2d, weights, biases, skip_connection=SKIP_CONNECTION,
                  match_bf16=False):
    """Pure-JAX reference.  match_bf16=True mirrors the kernel's bf16 dot
    operands (f32 accumulation) for a tight numerical comparison."""
    x = x2d.astype(jnp.float32)
    feat = x
    n_layers = len(weights)
    for li, (w, b) in enumerate(zip(weights, biases)):
        if li in skip_connection:
            feat = jnp.concatenate([feat, x], axis=-1)
        if match_bf16:
            feat = jnp.dot(feat.astype(jnp.bfloat16),
                           w.astype(jnp.bfloat16).T,
                           preferred_element_type=jnp.float32) + b
        else:
            feat = feat @ w.T + b
        if li != n_layers - 1:
            feat = jnp.maximum(feat, 0.0)
    return feat


if __name__ == "__main__":
    key = jax.random.PRNGKey(0)
    k_x, k_p = jax.random.split(key)

    # Small example: batch=2, seq=128, in_features=layer_dims[0]=4 -> [2,128,4]
    batch, seq = 2, 128
    x = jax.random.normal(k_x, (batch, seq, LAYER_DIMS[0]), jnp.float32)
    weights, biases = init_params(k_p, LAYER_DIMS, SKIP_CONNECTION)

    # Flatten leading dims -> [N, C] for the kernel, reshape back after.
    x2d = x.reshape(-1, LAYER_DIMS[0])
    out2d = mlp_with_skip_pallas(x2d, weights, biases)
    out = out2d.reshape(batch, seq, LAYER_DIMS[-1])
    jax.block_until_ready(out)

    # Tight check vs a reference that uses the same bf16 dot operands.
    ref_bf = reference_mlp(x2d, weights, biases, match_bf16=True)
    ref_bf = ref_bf.reshape(batch, seq, LAYER_DIMS[-1])
    assert jnp.allclose(out, ref_bf, atol=2e-3, rtol=2e-3), \
        "mismatch vs bf16-matched reference"

    # Looser sanity check vs the pure f32 reference (bf16 weight rounding).
    ref_f32 = reference_mlp(x2d, weights, biases, match_bf16=False)
    ref_f32 = ref_f32.reshape(batch, seq, LAYER_DIMS[-1])
    assert jnp.allclose(out, ref_f32, atol=1e-1, rtol=1e-1), \
        "mismatch vs f32 reference"

    print("KERNEL_OK")
</pallas_src>

<mosaic_0001>
module attributes {stable_mosaic.version = 11 : i64} {
  func.func @kernel(%arg0: i32, %arg1: memref<4x256xf32, #tpu.memory_space<vmem>>, %arg2: memref<64x4xbf16, #tpu.memory_space<vmem>>, %arg3: memref<32x1xf32, #tpu.memory_space<vmem>>, %arg4: memref<32x32xbf16, #tpu.memory_space<vmem>>, %arg5: memref<32x1xf32, #tpu.memory_space<vmem>>, %arg6: memref<32x32xbf16, #tpu.memory_space<vmem>>, %arg7: memref<32x1xf32, #tpu.memory_space<vmem>>, %arg8: memref<8x32xbf16, #tpu.memory_space<vmem>>, %arg9: memref<8x1xf32, #tpu.memory_space<vmem>>, %arg10: memref<8x256xf32, #tpu.memory_space<vmem>>) attributes {dimension_semantics = [#tpu.dimension_semantics<parallel>], iteration_bounds = array<i64: 1>, scalar_prefetch = 0 : i64, scratch_operands = 0 : i64, tpu.core_type = #tpu.core_type<tc>, window_params = [{transform_indices = @transform_0, window_bounds = array<i64: 4, 256>}, {pipeline_mode = #tpu.pipeline_mode<synchronous>, transform_indices = @transform_1, window_bounds = array<i64: 64, 4>}, {pipeline_mode = #tpu.pipeline_mode<synchronous>, transform_indices = @transform_2, window_bounds = array<i64: 32, 1>}, {pipeline_mode = #tpu.pipeline_mode<synchronous>, transform_indices = @transform_3, window_bounds = array<i64: 32, 32>}, {pipeline_mode = #tpu.pipeline_mode<synchronous>, transform_indices = @transform_4, window_bounds = array<i64: 32, 1>}, {pipeline_mode = #tpu.pipeline_mode<synchronous>, transform_indices = @transform_5, window_bounds = array<i64: 32, 32>}, {pipeline_mode = #tpu.pipeline_mode<synchronous>, transform_indices = @transform_6, window_bounds = array<i64: 32, 1>}, {pipeline_mode = #tpu.pipeline_mode<synchronous>, transform_indices = @transform_7, window_bounds = array<i64: 8, 32>}, {pipeline_mode = #tpu.pipeline_mode<synchronous>, transform_indices = @transform_8, window_bounds = array<i64: 8, 1>}, {transform_indices = @transform_9, window_bounds = array<i64: 8, 256>}]} {
    %c0 = arith.constant 0 : index
    %c0_0 = arith.constant 0 : index
    %0 = vector.load %arg1[%c0, %c0_0] : memref<4x256xf32, #tpu.memory_space<vmem>>, vector<4x256xf32>
    %1 = arith.truncf %0 : vector<4x256xf32> to vector<4x256xbf16>
    %c0_1 = arith.constant 0 : index
    %c0_2 = arith.constant 0 : index
    %2 = vector.load %arg2[%c0_1, %c0_2] : memref<64x4xbf16, #tpu.memory_space<vmem>>, vector<64x4xbf16>
    %c0_3 = arith.constant 0 : index
    %c0_4 = arith.constant 0 : index
    %3 = vector.load %arg3[%c0_3, %c0_4] : memref<32x1xf32, #tpu.memory_space<vmem>>, vector<32x1xf32>
    %cst = arith.constant dense<0.000000e+00> : vector<64x256xf32>
    %4 = tpu.matmul %2, %1, %cst {dimension_numbers = #tpu.dot_dimension_numbers<[1], [0], [0], [1], [0, 0, 1, 1], [], []>} : vector<64x4xbf16>, vector<4x256xbf16>, vector<64x256xf32> -> vector<64x256xf32>
    %5 = vector.extract_strided_slice %4 {offsets = [0, 0], sizes = [32, 256], strides = [1, 1]} : vector<64x256xf32> to vector<32x256xf32>
    %6 = vector.broadcast %3 : vector<32x1xf32> to vector<32x256xf32>
    %7 = arith.addf %5, %6 : vector<32x256xf32>
    %cst_5 = arith.constant 0.000000e+00 : f32
    %8 = vector.broadcast %cst_5 : f32 to vector<32x256xf32>
    %9 = arith.maximumf %7, %8 : vector<32x256xf32>
    %c0_6 = arith.constant 0 : index
    %c0_7 = arith.constant 0 : index
    %10 = vector.load %arg4[%c0_6, %c0_7] : memref<32x32xbf16, #tpu.memory_space<vmem>>, vector<32x32xbf16>
    %c0_8 = arith.constant 0 : index
    %c0_9 = arith.constant 0 : index
    %11 = vector.load %arg5[%c0_8, %c0_9] : memref<32x1xf32, #tpu.memory_space<vmem>>, vector<32x1xf32>
    %12 = arith.truncf %9 : vector<32x256xf32> to vector<32x256xbf16>
    %cst_10 = arith.constant dense<0.000000e+00> : vector<32x256xf32>
    %13 = tpu.matmul %10, %12, %cst_10 {dimension_numbers = #tpu.dot_dimension_numbers<[1], [0], [0], [1], [0, 0, 1, 1], [], []>} : vector<32x32xbf16>, vector<32x256xbf16>, vector<32x256xf32> -> vector<32x256xf32>
    %14 = vector.broadcast %11 : vector<32x1xf32> to vector<32x256xf32>
    %15 = arith.addf %13, %14 : vector<32x256xf32>
    %cst_11 = arith.constant 0.000000e+00 : f32
    %16 = vector.broadcast %cst_11 : f32 to vector<32x256xf32>
    %17 = arith.maximumf %15, %16 : vector<32x256xf32>
    %c0_12 = arith.constant 0 : index
    %c0_13 = arith.constant 0 : index
    %18 = vector.load %arg6[%c0_12, %c0_13] : memref<32x32xbf16, #tpu.memory_space<vmem>>, vector<32x32xbf16>
    %c0_14 = arith.constant 0 : index
    %c0_15 = arith.constant 0 : index
    %19 = vector.load %arg7[%c0_14, %c0_15] : memref<32x1xf32, #tpu.memory_space<vmem>>, vector<32x1xf32>
    %20 = arith.truncf %17 : vector<32x256xf32> to vector<32x256xbf16>
    %cst_16 = arith.constant dense<0.000000e+00> : vector<32x256xf32>
    %21 = tpu.matmul %18, %20, %cst_16 {dimension_numbers = #tpu.dot_dimension_numbers<[1], [0], [0], [1], [0, 0, 1, 1], [], []>} : vector<32x32xbf16>, vector<32x256xbf16>, vector<32x256xf32> -> vector<32x256xf32>
    %22 = vector.broadcast %19 : vector<32x1xf32> to vector<32x256xf32>
    %23 = arith.addf %21, %22 : vector<32x256xf32>
    %24 = vector.extract_strided_slice %4 {offsets = [32, 0], sizes = [32, 256], strides = [1, 1]} : vector<64x256xf32> to vector<32x256xf32>
    %25 = arith.addf %23, %24 : vector<32x256xf32>
    %cst_17 = arith.constant 0.000000e+00 : f32
    %26 = vector.broadcast %cst_17 : f32 to vector<32x256xf32>
    %27 = arith.maximumf %25, %26 : vector<32x256xf32>
    %c0_18 = arith.constant 0 : index
    %c0_19 = arith.constant 0 : index
    %28 = vector.load %arg8[%c0_18, %c0_19] : memref<8x32xbf16, #tpu.memory_space<vmem>>, vector<8x32xbf16>
    %c0_20 = arith.constant 0 : index
    %c0_21 = arith.constant 0 : index
    %29 = vector.load %arg9[%c0_20, %c0_21] : memref<8x1xf32, #tpu.memory_space<vmem>>, vector<8x1xf32>
    %30 = arith.truncf %27 : vector<32x256xf32> to vector<32x256xbf16>
    %cst_22 = arith.constant dense<0.000000e+00> : vector<8x256xf32>
    %31 = tpu.matmul %28, %30, %cst_22 {dimension_numbers = #tpu.dot_dimension_numbers<[1], [0], [0], [1], [0, 0, 1, 1], [], []>} : vector<8x32xbf16>, vector<32x256xbf16>, vector<8x256xf32> -> vector<8x256xf32>
    %32 = vector.broadcast %29 : vector<8x1xf32> to vector<8x256xf32>
    %33 = arith.addf %31, %32 : vector<8x256xf32>
    %c0_23 = arith.constant 0 : index
    %c0_24 = arith.constant 0 : index
    %34 = vector.load %arg10[%c0_23, %c0_24] : memref<8x256xf32, #tpu.memory_space<vmem>>, vector<8x256xf32>
    tpu.vector_store %arg10[%c0_23, %c0_24], %33 {strides = array<i32>} : memref<8x256xf32, #tpu.memory_space<vmem>>, vector<8x256xf32>,
    return
  }
  func.func @transform_0(%arg0: i32) -> (i32, i32) {
    %c0_i32 = arith.constant 0 : i32
    %c0_i32_0 = arith.constant 0 : i32
    return %c0_i32, %arg0 : i32, i32
  }
  func.func @transform_1(%arg0: i32) -> (i32, i32) {
    %c0_i32 = arith.constant 0 : i32
    %c0_i32_0 = arith.constant 0 : i32
    %c0_i32_1 = arith.constant 0 : i32
    return %c0_i32, %c0_i32_0 : i32, i32
  }
  func.func @transform_2(%arg0: i32) -> (i32, i32) {
    %c0_i32 = arith.constant 0 : i32
    %c0_i32_0 = arith.constant 0 : i32
    %c0_i32_1 = arith.constant 0 : i32
    return %c0_i32, %c0_i32_0 : i32, i32
  }
  func.func @transform_3(%arg0: i32) -> (i32, i32) {
    %c0_i32 = arith.constant 0 : i32
    %c0_i32_0 = arith.constant 0 : i32
    %c0_i32_1 = arith.constant 0 : i32
    return %c0_i32, %c0_i32_0 : i32, i32
  }
  func.func @transform_4(%arg0: i32) -> (i32, i32) {
    %c0_i32 = arith.constant 0 : i32
    %c0_i32_0 = arith.constant 0 : i32
    %c0_i32_1 = arith.constant 0 : i32
    return %c0_i32, %c0_i32_0 : i32, i32
  }
  func.func @transform_5(%arg0: i32) -> (i32, i32) {
    %c0_i32 = arith.constant 0 : i32
    %c0_i32_0 = arith.constant 0 : i32
    %c0_i32_1 = arith.constant 0 : i32
    return %c0_i32, %c0_i32_0 : i32, i32
  }
  func.func @transform_6(%arg0: i32) -> (i32, i32) {
    %c0_i32 = arith.constant 0 : i32
    %c0_i32_0 = arith.constant 0 : i32
    %c0_i32_1 = arith.constant 0 : i32
    return %c0_i32, %c0_i32_0 : i32, i32
  }
  func.func @transform_7(%arg0: i32) -> (i32, i32) {
    %c0_i32 = arith.constant 0 : i32
    %c0_i32_0 = arith.constant 0 : i32
    %c0_i32_1 = arith.constant 0 : i32
    return %c0_i32, %c0_i32_0 : i32, i32
  }
  func.func @transform_8(%arg0: i32) -> (i32, i32) {
    %c0_i32 = arith.constant 0 : i32
    %c0_i32_0 = arith.constant 0 : i32
    %c0_i32_1 = arith.constant 0 : i32
    return %c0_i32, %c0_i32_0 : i32, i32
  }
  func.func @transform_9(%arg0: i32) -> (i32, i32) {
    %c0_i32 = arith.constant 0 : i32
    %c0_i32_0 = arith.constant 0 : i32
    return %c0_i32, %arg0 : i32, i32
  }
}

</mosaic_0001>

<bundles_post_ra>
// kernel: tpu_custom_call.1
= control target key start
LH: loop header
LB: loop body
LE: loop exit
PB: predicated region body
PF: predicated region fallthrough
CT: control target
= control target key end

     0   :  { %v533_v2 = vmov 0   ;;  %s675_s0 = inlined_call_operand.vmem [shape: f32[4,256], index: 0, kind: input, shape index: {}]   ;;  %s676_s1 = inlined_call_operand.vmem [shape: bf16[64,4], index: 1, kind: input, shape index: {}]   ;;  %s677_s2 = inlined_call_operand.vmem [shape: f32[32,1], index: 2, kind: input, shape index: {}]   ;;  %s678_s3 = inlined_call_operand.vmem [shape: bf16[32,32], index: 3, kind: input, shape index: {}]   ;;  %s679_s4 = inlined_call_operand.vmem [shape: f32[32,1], index: 4, kind: input, shape index: {}]   ;;  %s680_s5 = inlined_call_operand.vmem [shape: bf16[32,32], index: 5, kind: input, shape index: {}]   ;;  %s681_s6 = inlined_call_operand.vmem [shape: f32[32,1], index: 6, kind: input, shape index: {}]   ;;  %s682_s7 = inlined_call_operand.vmem [shape: bf16[8,32], index: 7, kind: input, shape index: {}]   ;;  %s683_s8 = inlined_call_operand.vmem [shape: f32[8,1], index: 8, kind: input, shape index: {}]   ;;  %s684_s9 = inlined_call_operand.hbm [shape: f32[8,256], index: 9, kind: output, shape index: {}]  }
   0x1   :  { %v53_v0 = vld [vmem:[%s677_s2 + $0x10] sm:$0xff]  ;;  %v34_v1 = vld [vmem:[%s675_s0] sm:$0xff]  ;;  %504 = vset.pattern.permute.xlu0 %v533_v2  ;;  %505 = vset.pattern.permute.xlu1 %v533_v2 }
   0x2   :  { %36 = vst [vmem:[#allocation1] ss:$2 sm:$0xff] %v34_v1  ;;  %v51_v3 = vld [vmem:[%s677_s2] sm:$0xff]  ;;  %165 = vperm.xlu0 %504, %v53_v0   ;;  %506 = vset.pattern.permute.xlu2 %v533_v2 }
   0x3   :  { %155 = vperm.xlu1 %505, %v51_v3  }
   0x4   :  { %14 = vsyncpa [#allocation3], 0  ;;  %vm88_vm0 = vcmask 1041408   ;;  %v54_v4 = vld [vmem:[%s677_s2 + $0x18] sm:$0xff]  ;;  %v52_v5 = vld [vmem:[%s677_s2 + $0x8] sm:$0xff]  ;;  %vm75_vm1 = vcmask 31744  }
   0x5   :  { %v494_v12 = vld [vmem:[%s676_s1] sm:$0xff]  ;;  %v194_v14 = vld [vmem:[%s679_s4 + $0x8] sm:$0xff]  ;;  %v291_v15 = vld [vmem:[%s681_s6 + $0x18] sm:$0xff]  ;;  %vm231_vm2 = vcmask 261120   ;;  %s534_s24 = smov [#allocation2]   ;;  %s435_s28 = sshll.u32 %s684_s9, 4  ;;  %s436_s28 = int_to_ptr.hbm [resolvable:$true] %s435_s28 }
   0x6   :  { %v193_v13 = vld [vmem:[%s679_s4] sm:$0xff]  ;;  %v495_v17 = vld [vmem:[%s676_s1 + $0x8] sm:$0xff]  ;;  %v195_v27 = vld [vmem:[%s679_s4 + $0x10] sm:$0xff]  ;;  %s433_s25 = sshll.u32 %s534_s24, 4  ;;  %s434_s25 = int_to_ptr.vmem [resolvable:$true] %s433_s25 }
   0x7   :  { %v288_v16 = vld [vmem:[%s681_s6] sm:$0xff]  ;;  %213 = vperm.xlu2 %506, %v195_v27   ;;  %v196_v48 = vld [vmem:[%s679_s4 + $0x18] sm:$0xff]  ;;  %v290_v54 = vld [vmem:[%s681_s6 + $0x10] sm:$0xff] }
   0x8   :  { %v387_v18 = vld [vmem:[%s683_s8] sm:$0xff]  ;;  %v289_v55 = vld [vmem:[%s681_s6 + $0x8] sm:$0xff]  ;;  %v496_v59 = vld [vmem:[%s676_s1 + $0x10] sm:$0xff] }
   0x9   :  { %v37_v6 = vld.sshfl [vmem:[#allocation1] sm:$0xff pattern:$0x75316420]  ;;  %v38_v7 = vld.sshfl [vmem:[#allocation1 + $0x8] sm:$0xff pattern:$0x75316420] }
   0xa   :  { %v41_v8 = vpack.c.bf16 %v37_v6, %v37_v6  ;;  %v42_v9 = vpack.c.bf16 %v38_v7, %v38_v7  ;;  %170 = vperm.xlu0 %504, %v54_v4   ;;  %v498_v53 = vld [vmem:[%s678_s3] sm:$0xff]  ;;  %v499_v56 = vld [vmem:[%s678_s3 + $0x8] sm:$0xff]  ;;  %v497_v1 = vld [vmem:[%s676_s1 + $0x18] sm:$0xff] }
   0xb   :  { %160 = vperm.xlu1 %505, %v52_v5   ;;  %v500_v27 = vld [vmem:[%s680_s5] sm:$0xff] }
   0xc   :  { %v90_v10 = vsel %vm88_vm0, %v41_v8, 0  ;;  %v93_v11 = vsel %vm88_vm0, %v42_v9, 0 }
   0xd   :  { %102 = vmatpush.bf16.msra.mxu0 %v90_v10  ;;  %131 = vmatpush.bf16.msra.mxu1 %v93_v11 }
   0xf   :  { %218 = vperm.xlu2 %506, %v196_v48  }
  0x10   :  { %460 = vmatmul.msk.bf16.vlgmr.msra.gmra.mxu0 %vm75_vm1, %v494_v12  ;;  %464 = vmatmul.msk.bf16.vlgmr.msra.gmra.mxu1 %vm75_vm1, %v494_v12 }
  0x12   :  { %203 = vperm.xlu0 %504, %v193_v13  }
  0x13   :  { %208 = vperm.xlu1 %505, %v194_v14  }
  0x17   :  { %308 = vperm.xlu2 %506, %v290_v54  }
  0x1a   :  { %313 = vperm.xlu0 %504, %v291_v15  }
  0x1b   :  { %298 = vperm.xlu1 %505, %v288_v16  }
  0x1f   :  { %303 = vperm.xlu2 %506, %v289_v55  }
  0x20   :  { %461 = vmatmul.msk.bf16.gmra.mxu0 %vm75_vm1, %v495_v17  ;;  %465 = vmatmul.msk.bf16.gmra.mxu1 %vm75_vm1, %v495_v17 }
  0x22   :  { %394 = vperm.xlu0 %504, %v387_v18  }
  0x30   :  { %462 = vmatmul.msk.bf16.gmra.mxu0 %vm75_vm1, %v496_v59  ;;  %466 = vmatmul.msk.bf16.gmra.mxu1 %vm75_vm1, %v496_v59 }
  0x40   :  { %463 = vmatmul.msk.bf16.gmra.mxu0 %vm75_vm1, %v497_v1  ;;  %467 = vmatmul.msk.bf16.gmra.mxu1 %vm75_vm1, %v497_v1 }
  0x61   :  { %v214_v62 = vpop.permute.xlu2 %213 }
  0x69   :  { %v219_v3 = vpop.permute.xlu2 %218 }
  0x74   :  { %v166_v23 = vpop.permute.xlu0 %165 }
  0x75   :  { %v156_v24 = vpop.permute.xlu1 %155 }
  0x7c   :  { %v171_v28 = vpop.permute.xlu0 %170 }
  0x7d   :  { %v161_v29 = vpop.permute.xlu1 %160 }
  0x84   :  { %v204_v8 = vpop.permute.xlu0 %203 }
  0x85   :  { %v209_v2 = vpop.permute.xlu1 %208 }
  0x8d   :  { %v104_v19 = vpop.f32.mrf.mxu0  ;;  %v133_v20 = vpop.f32.mrf.mxu1 }
  0x8e   :  { %v173_v38 = vadd.f32 %v156_v24, %v104_v19  ;;  %v174_v39 = vadd.f32 %v156_v24, %v133_v20 }
  0x90   :  { %v181_v49 = vmax.f32 %v173_v38, 0.0  ;;  %v182_v50 = vmax.f32 %v174_v39, 0.0 }
  0x95   :  { %v106_v21 = vpop.f32.mrf.mxu0  ;;  %v135_v22 = vpop.f32.mrf.mxu1 }
  0x96   :  { %v175_v34 = vadd.f32 %v161_v29, %v106_v21  ;;  %v176_v35 = vadd.f32 %v161_v29, %v135_v22 }
  0x98   :  { %v183_v44 = vmax.f32 %v175_v34, 0.0  ;;  %v184_v45 = vmax.f32 %v176_v35, 0.0 }
  0x9a   :  { %v197_v51 = vpack.c.bf16 %v183_v44, %v181_v49  ;;  %v198_v52 = vpack.c.bf16 %v184_v45, %v182_v50  ;;  %v314_v45 = vpop.permute.xlu0 %313 }
  0x9d   :  { %v109_v25 = vpop.f32.mrf.mxu0  ;;  %v138_v26 = vpop.f32.mrf.mxu1 }
  0x9e   :  { %v177_v30 = vadd.f32 %v166_v23, %v109_v25  ;;  %v178_v31 = vadd.f32 %v166_v23, %v138_v26 }
  0xa0   :  { %v185_v40 = vmax.f32 %v177_v30, 0.0  ;;  %v186_v41 = vmax.f32 %v178_v31, 0.0 }
  0xa5   :  { %v111_v32 = vpop.f32.mrf.mxu0  ;;  %v140_v33 = vpop.f32.mrf.mxu1 }
  0xa6   :  { %v179_v36 = vadd.f32 %v171_v28, %v111_v32  ;;  %v180_v37 = vadd.f32 %v171_v28, %v140_v33  ;;  %v501_v28 = vld [vmem:[%s680_s5 + $0x8] sm:$0xff] }
  0xa8   :  { %v187_v42 = vmax.f32 %v179_v36, 0.0  ;;  %v188_v43 = vmax.f32 %v180_v37, 0.0  ;;  %v309_v37 = vpop.permute.xlu2 %308 }
  0xaa   :  { %v199_v46 = vpack.c.bf16 %v187_v42, %v185_v40  ;;  %v200_v47 = vpack.c.bf16 %v188_v43, %v186_v41 }
  0xac   :  { %244 = vmatpush.bf16.msra.mxu2 %v199_v46  ;;  %263 = vmatpush.bf16.msra.mxu3 %v200_v47  ;;  %v299_v46 = vpop.permute.xlu1 %298 }
  0xad   :  { %v114_v29 = vpop.f32.mrf.mxu0  ;;  %v143_v30 = vpop.f32.mrf.mxu1 }
  0xb0   :  { %245 = vmatpush.bf16.msra.mxu2 %v197_v51  ;;  %264 = vmatpush.bf16.msra.mxu3 %v198_v52  ;;  %v304_v44 = vpop.permute.xlu2 %303 }
  0xb3   :  { %476 = vmatmul.msk.bf16.vlgmr.msra.gmra.mxu2 %vm231_vm2, %v498_v53  ;;  %478 = vmatmul.msk.bf16.vlgmr.msra.gmra.mxu3 %vm231_vm2, %v498_v53 }
  0xb5   :  { %v116_v33 = vpop.f32.mrf.mxu0  ;;  %v145_v34 = vpop.f32.mrf.mxu1 }
  0xbd   :  { %v119_v38 = vpop.f32.mrf.mxu0  ;;  %v148_v39 = vpop.f32.mrf.mxu1 }
  0xc3   :  { %477 = vmatmul.msk.bf16.gmra.mxu2 %vm231_vm2, %v499_v56  ;;  %479 = vmatmul.msk.bf16.gmra.mxu3 %vm231_vm2, %v499_v56 }
 0x136   :  { %v247_v57 = vpop.f32.mrf.mxu2  ;;  %v266_v58 = vpop.f32.mrf.mxu3 }
 0x137   :  { %v248_v13 = vadd.f32 %v247_v57, %v204_v8  ;;  %v267_v14 = vadd.f32 %v266_v58, %v204_v8  ;;  %v121_v57 = vpop.f32.mrf.mxu0  ;;  %v150_v58 = vpop.f32.mrf.mxu1 }
 0x139   :  { %v276_v23 = vmax.f32 %v248_v13, 0.0  ;;  %v277_v24 = vmax.f32 %v267_v14, 0.0  ;;  %v386_v13 = vld [vmem:[%s682_s7] sm:$0xf]  ;;  %v395_v14 = vpop.permute.xlu0 %394 }
 0x13e   :  { %v249_v60 = vpop.f32.mrf.mxu2  ;;  %v268_v61 = vpop.f32.mrf.mxu3 }
 0x13f   :  { %v250_v9 = vadd.f32 %v249_v60, %v209_v2  ;;  %v269_v10 = vadd.f32 %v268_v61, %v209_v2 }
 0x141   :  { %v278_v19 = vmax.f32 %v250_v9, 0.0  ;;  %v279_v20 = vmax.f32 %v269_v10, 0.0 }
 0x143   :  { %v292_v25 = vpack.c.bf16 %v278_v19, %v276_v23  ;;  %v293_v26 = vpack.c.bf16 %v279_v20, %v277_v24 }
 0x146   :  { %v252_v63 = vpop.f32.mrf.mxu2  ;;  %v271_v0 = vpop.f32.mrf.mxu3 }
 0x147   :  { %v253_v4 = vadd.f32 %v252_v63, %v214_v62  ;;  %v272_v5 = vadd.f32 %v271_v0, %v214_v62 }
 0x149   :  { %v280_v15 = vmax.f32 %v253_v4, 0.0  ;;  %v281_v16 = vmax.f32 %v272_v5, 0.0 }
 0x14e   :  { %v254_v6 = vpop.f32.mrf.mxu2  ;;  %v273_v7 = vpop.f32.mrf.mxu3 }
 0x14f   :  { %v255_v11 = vadd.f32 %v254_v6, %v219_v3  ;;  %v274_v12 = vadd.f32 %v273_v7, %v219_v3 }
 0x151   :  { %v282_v17 = vmax.f32 %v255_v11, 0.0  ;;  %v283_v18 = vmax.f32 %v274_v12, 0.0 }
 0x153   :  { %v294_v21 = vpack.c.bf16 %v282_v17, %v280_v15  ;;  %v295_v22 = vpack.c.bf16 %v283_v18, %v281_v16 }
 0x155   :  { %338 = vmatpush.bf16.msrb.mxu2 %v294_v21  ;;  %357 = vmatpush.bf16.msrb.mxu3 %v295_v22 }
 0x159   :  { %339 = vmatpush.bf16.msrb.mxu2 %v292_v25  ;;  %358 = vmatpush.bf16.msrb.mxu3 %v293_v26 }
 0x15c   :  { %488 = vmatmul.msk.bf16.vlgmr.msrb.gmra.mxu2 %vm231_vm2, %v500_v27  ;;  %490 = vmatmul.msk.bf16.vlgmr.msrb.gmra.mxu3 %vm231_vm2, %v500_v27 }
 0x16c   :  { %489 = vmatmul.msk.bf16.gmra.mxu2 %vm231_vm2, %v501_v28  ;;  %491 = vmatmul.msk.bf16.gmra.mxu3 %vm231_vm2, %v501_v28 }
 0x1df   :  { %v341_v31 = vpop.f32.mrf.mxu2  ;;  %v360_v32 = vpop.f32.mrf.mxu3 }
 0x1e0   :  { %v342_v49 = vadd.f32 %v341_v31, %v299_v46  ;;  %v361_v50 = vadd.f32 %v360_v32, %v299_v46 }
 0x1e2   :  { %v370_v63 = vadd.f32 %v342_v49, %v114_v29  ;;  %v371_v0 = vadd.f32 %v361_v50, %v143_v30 }
 0x1e4   :  { %v378_v9 = vmax.f32 %v370_v63, 0.0  ;;  %v379_v10 = vmax.f32 %v371_v0, 0.0 }
 0x1e7   :  { %v343_v35 = vpop.f32.mrf.mxu2  ;;  %v362_v36 = vpop.f32.mrf.mxu3 }
 0x1e8   :  { %v344_v47 = vadd.f32 %v343_v35, %v304_v44  ;;  %v363_v48 = vadd.f32 %v362_v36, %v304_v44 }
 0x1ea   :  { %v372_v59 = vadd.f32 %v344_v47, %v116_v33  ;;  %v373_v60 = vadd.f32 %v363_v48, %v145_v34 }
 0x1ec   :  { %v380_v5 = vmax.f32 %v372_v59, 0.0  ;;  %v381_v6 = vmax.f32 %v373_v60, 0.0 }
 0x1ee   :  { %v388_v11 = vpack.c.bf16 %v380_v5, %v378_v9  ;;  %v389_v12 = vpack.c.bf16 %v381_v6, %v379_v10 }
 0x1ef   :  { %v346_v40 = vpop.f32.mrf.mxu2  ;;  %v365_v41 = vpop.f32.mrf.mxu3 }
 0x1f0   :  { %v347_v42 = vadd.f32 %v346_v40, %v309_v37  ;;  %v366_v43 = vadd.f32 %v365_v41, %v309_v37 }
 0x1f2   :  { %v374_v53 = vadd.f32 %v347_v42, %v119_v38  ;;  %v375_v54 = vadd.f32 %v366_v43, %v148_v39 }
 0x1f4   :  { %v382_v1 = vmax.f32 %v374_v53, 0.0  ;;  %v383_v2 = vmax.f32 %v375_v54, 0.0 }
 0x1f7   :  { %v348_v51 = vpop.f32.mrf.mxu2  ;;  %v367_v52 = vpop.f32.mrf.mxu3 }
 0x1f8   :  { %v349_v55 = vadd.f32 %v348_v51, %v314_v45  ;;  %v368_v56 = vadd.f32 %v367_v52, %v314_v45 }
 0x1fa   :  { %v376_v61 = vadd.f32 %v349_v55, %v121_v57  ;;  %v377_v62 = vadd.f32 %v368_v56, %v150_v58 }
 0x1fc   :  { %v384_v3 = vmax.f32 %v376_v61, 0.0  ;;  %v385_v4 = vmax.f32 %v377_v62, 0.0 }
 0x1fe   :  { %v390_v7 = vpack.c.bf16 %v384_v3, %v382_v1  ;;  %v391_v8 = vpack.c.bf16 %v385_v4, %v383_v2 }
 0x200   :  { %406 = vmatpush.bf16.msrb.mxu0 %v390_v7  ;;  %419 = vmatpush.bf16.msrb.mxu1 %v391_v8 }
 0x204   :  { %407 = vmatpush.bf16.msrb.mxu0 %v388_v11  ;;  %420 = vmatpush.bf16.msrb.mxu1 %v389_v12 }
 0x207   :  { %492 = vmatmul.msk.bf16.vlgmr.msrb.gmra.mxu0 %vm231_vm2, %v386_v13  ;;  %493 = vmatmul.msk.bf16.vlgmr.msrb.gmra.mxu1 %vm231_vm2, %v386_v13 }
 0x284   :  { %v409_v15 = vpop.f32.mrf.mxu0  ;;  %v422_v16 = vpop.f32.mrf.mxu1 }
 0x285   :  { %v410_v17 = vadd.f32 %v409_v15, %v395_v14  ;;  %v423_v18 = vadd.f32 %v422_v16, %v395_v14 }
 0x287   :  { %426 = vst [vmem:[#allocation2] sm:$0xff] %v410_v17 }
 0x288   :  { %427 = vst [vmem:[#allocation2 + $0x8] sm:$0xff] %v423_v18 }
 0x289   :  { %438 = dma.vmem_to_hbm [thread:$0]  %s434_s25, 256, %s436_s28, [#allocation3]  }
 0x28c   :  { %v411_v19 = vpop.f32.mrf.mxu0  ;;  %v424_v20 = vpop.f32.mrf.mxu1 }
 0x28d   :  { %531 = dma.done.wait [#allocation3], 256  }
 0x28e   :  { %532 = vsyncadd [#allocation3], 4294967040 }
 0x28f   :  { %443 = vsyncpa [#allocation3], 1 }

</bundles_post_ra>
